<compile_context>
chip_gen: v7x
topology: tpu7x:2x2x1
jax: 0.10.0
libtpu: 0.0.40
codegen_flags: <defaults>
</compile_context>

<pallas_src>
import functools

import jax
import jax.numpy as jnp
from jax.experimental import pallas as pl
from jax.experimental.pallas import tpu as pltpu

GAMMA = 2
ALPHA = 0.25


def _static_pow(base, gamma):
    """base**gamma with a trace-time exponent; small integer gammas -> multiply chain."""
    g = float(gamma)
    if g == 0.0:
        return jnp.ones_like(base)
    if g.is_integer() and 0 < g <= 16:
        n = int(g)
        result = None
        b = base
        while n:
            if n & 1:
                result = b if result is None else result * b
            n >>= 1
            if n:
                b = b * b
        return result
    return base ** g  # non-integer gamma: fall back to pow (EUP exp/log)


def _focal_loss_kernel(x_ref, y_ref, o_ref, acc_ref, *, gamma, alpha,
                       tile_n, n_inner, n_valid, needs_mask):
    o = pl.program_id(0)   # parallel (megacore) axis
    i = pl.program_id(1)   # sequential reduction axis

    @pl.when(i == 0)
    def _():
        acc_ref[...] = jnp.zeros_like(acc_ref)

    x = x_ref[...].astype(jnp.float32)          # (TN, C)
    y = y_ref[...]                               # (TN, 1) int32

    # one-hot target: compare class iota (lanes) against the label column
    cls = jax.lax.broadcasted_iota(jnp.int32, x.shape, 1)
    t = (cls == y).astype(jnp.float32)           # (TN, C)

    # shared exp(-|x|) between sigmoid and the stable BCE-with-logits term
    e = jnp.exp(-jnp.abs(x))                     # single EUP exp per element
    inv = 1.0 / (1.0 + e)
    p = jnp.where(x >= 0.0, inv, e * inv)        # == sigmoid(x)

    pt = p * t + (1.0 - p) * (1.0 - t)
    d = 1.0 - pt
    w = alpha * t + (1.0 - alpha) * (1.0 - t)
    w = w * _static_pow(d, gamma)                # gamma=2 -> d*d (no float pow)

    # numerically stable BCE-with-logits (same formulation as torch)
    bce = jnp.maximum(x, 0.0) - x * t + jnp.log1p(e)
    contrib = w * bce

    if needs_mask:
        tile_idx = o * n_inner + i
        row = jax.lax.broadcasted_iota(jnp.int32, x.shape, 0) + tile_idx * tile_n
        contrib = jnp.where(row < n_valid, contrib, 0.0)

    # lane-wide accumulator: sublane-only reduce per step
    acc_ref[...] += jnp.sum(contrib, axis=0, keepdims=True)   # (1, C)

    @pl.when(i == pl.num_programs(1) - 1)
    def _():
        # single cross-lane reduce + scalar store, once per outer slice
        o_ref[0] = jnp.sum(acc_ref[...], keepdims=True)        # (1, 1)


def focal_loss(x, y, *, gamma=GAMMA, alpha=ALPHA, tile_n=None):
    """x: (N, C) float, y: (N,) int class indices. Returns scalar f32 sum."""
    N, C = x.shape
    y = y.astype(jnp.int32)
    itemsize = jnp.dtype(x.dtype).itemsize

    # --- tile sizing: target ~2 MiB of VMEM per (x + y) block pair -------------
    lanes_c = ((C + 127) // 128) * 128
    vmem_row_bytes = lanes_c * itemsize + 128 * 4       # x row (lane-padded) + y row (padded)
    if tile_n is None:
        tile_n = (2 << 20) // vmem_row_bytes
    n_rows8 = max(8, ((N + 7) // 8) * 8)
    tile_n = max(8, min(2048, tile_n, n_rows8))
    tile_n = (tile_n // 8) * 8

    num_tiles = pl.cdiv(N, tile_n)
    # split into (parallel outer, arbitrary inner) so both v7x TCs can be used
    n_outer = 2 if (num_tiles >= 2 and num_tiles % 2 == 0) else 1
    n_inner = num_tiles // n_outer
    n_pad = num_tiles * tile_n

    if n_pad != N:
        x = jnp.pad(x, ((0, n_pad - N), (0, 0)))
        y = jnp.pad(y, (0, n_pad - N))
    y2d = y.reshape(n_pad, 1)

    kernel = functools.partial(
        _focal_loss_kernel, gamma=gamma, alpha=alpha, tile_n=tile_n,
        n_inner=n_inner, n_valid=N, needs_mask=(n_pad != N))

    partials = pl.pallas_call(
        kernel,
        out_shape=jax.ShapeDtypeStruct((n_outer, 1, 1), jnp.float32),
        grid_spec=pltpu.PrefetchScalarGridSpec(
            num_scalar_prefetch=0,
            grid=(n_outer, n_inner),
            in_specs=[
                pl.BlockSpec((tile_n, C), lambda o, i: (o * n_inner + i, 0)),
                pl.BlockSpec((tile_n, 1), lambda o, i: (o * n_inner + i, 0)),
            ],
            out_specs=pl.BlockSpec((1, 1, 1), lambda o, i: (o, 0, 0)),
            scratch_shapes=[pltpu.VMEM((1, C), jnp.float32)],
        ),
        compiler_params=pltpu.CompilerParams(
            dimension_semantics=("parallel", "arbitrary"),
        ),
    )(x, y2d)
    return jnp.sum(partials)


def _focal_loss_ref(x, y, gamma=GAMMA, alpha=ALPHA):
    C = x.shape[1]
    t = jax.nn.one_hot(y, C, dtype=jnp.float32)
    x = x.astype(jnp.float32)
    p = jax.nn.sigmoid(x)
    pt = p * t + (1 - p) * (1 - t)
    w = (alpha * t + (1 - alpha) * (1 - t)) * (1 - pt) ** gamma
    bce = jnp.maximum(x, 0.0) - x * t + jnp.log1p(jnp.exp(-jnp.abs(x)))
    return jnp.sum(w * bce)


if __name__ == "__main__":
    key = jax.random.PRNGKey(0)

    # case 1: small shape, single tile (auto tile size)
    kx, ky = jax.random.split(key)
    N, C = 16, 10
    x = jax.random.normal(kx, (N, C), dtype=jnp.float32)
    y = jax.random.randint(ky, (N,), 0, C, dtype=jnp.int32)
    out = focal_loss(x, y)
    jax.block_until_ready(out)
    ref = _focal_loss_ref(x, y)
    assert jnp.allclose(out, ref, rtol=1e-4, atol=1e-4), (out, ref)

    # case 2: exercises N-padding mask + (parallel, arbitrary) megacore split
    kx2, ky2 = jax.random.split(ky)
    N2, C2 = 120, 10
    x2 = jax.random.normal(kx2, (N2, C2), dtype=jnp.float32)
    y2 = jax.random.randint(ky2, (N2,), 0, C2, dtype=jnp.int32)
    out2 = focal_loss(x2, y2, tile_n=16)
    jax.block_until_ready(out2)
    ref2 = _focal_loss_ref(x2, y2)
    assert jnp.allclose(out2, ref2, rtol=1e-4, atol=1e-4), (out2, ref2)

    print("KERNEL_OK")
</pallas_src>

<mosaic_0001>
module attributes {stable_mosaic.version = 11 : i64} {
  func.func @_focal_loss_kernel(%arg0: i32, %arg1: i32, %arg2: memref<16x10xf32, #tpu.memory_space<vmem>>, %arg3: memref<16x1xi32, #tpu.memory_space<vmem>>, %arg4: memref<1x1x1xf32, #tpu.memory_space<vmem>>, %arg5: memref<1x10xf32, #tpu.memory_space<vmem>>) attributes {dimension_semantics = [#tpu.dimension_semantics<parallel>, #tpu.dimension_semantics<arbitrary>], iteration_bounds = array<i64: 1, 1>, scalar_prefetch = 0 : i64, scratch_operands = 1 : i64, tpu.core_type = #tpu.core_type<tc>, window_params = [{transform_indices = @transform_0, window_bounds = array<i64: 16, 10>}, {transform_indices = @transform_1, window_bounds = array<i64: 16, 1>}, {transform_indices = @transform_2, window_bounds = array<i64: 1, 1, 1>}]} {
    %c0_i32 = arith.constant 0 : i32
    %0 = arith.cmpi eq, %arg1, %c0_i32 : i32
    %1 = arith.extui %0 : i1 to i32
    %c0_i32_0 = arith.constant 0 : i32
    %2 = arith.cmpi ne, %1, %c0_i32_0 : i32
    scf.if %2 {
      %cst_21 = arith.constant 0.000000e+00 : f32
      %55 = vector.broadcast %cst_21 : f32 to vector<1x10xf32>
      %c0_22 = arith.constant 0 : index
      %c0_23 = arith.constant 0 : index
      %56 = vector.load %arg5[%c0_22, %c0_23] : memref<1x10xf32, #tpu.memory_space<vmem>>, vector<1x10xf32>
      tpu.vector_store %arg5[%c0_22, %c0_23], %55 {strides = array<i32>} : memref<1x10xf32, #tpu.memory_space<vmem>>, vector<1x10xf32>,
    } else {
    }
    %c0 = arith.constant 0 : index
    %c0_1 = arith.constant 0 : index
    %3 = vector.load %arg2[%c0, %c0_1] : memref<16x10xf32, #tpu.memory_space<vmem>>, vector<16x10xf32>
    %c0_2 = arith.constant 0 : index
    %c0_3 = arith.constant 0 : index
    %4 = vector.load %arg3[%c0_2, %c0_3] : memref<16x1xi32, #tpu.memory_space<vmem>>, vector<16x1xi32>
    %5 = tpu.iota {dimensions = array<i32: 1>} : vector<16x10xi32>
    %6 = vector.broadcast %4 : vector<16x1xi32> to vector<16x10xi32>
    %7 = arith.cmpi eq, %5, %6 : vector<16x10xi32>
    %8 = arith.extui %7 : vector<16x10xi1> to vector<16x10xi32>
    %9 = arith.sitofp %8 : vector<16x10xi32> to vector<16x10xf32>
    %10 = math.absf %3 : vector<16x10xf32>
    %cst = arith.constant 0.000000e+00 : f32
    %11 = vector.broadcast %cst : f32 to vector<16x10xf32>
    %12 = arith.subf %11, %10 : vector<16x10xf32>
    %13 = math.exp %12 : vector<16x10xf32>
    %cst_4 = arith.constant 1.000000e+00 : f32
    %14 = vector.broadcast %cst_4 : f32 to vector<16x10xf32>
    %15 = arith.addf %14, %13 : vector<16x10xf32>
    %cst_5 = arith.constant 1.000000e+00 : f32
    %16 = vector.broadcast %cst_5 : f32 to vector<16x10xf32>
    %17 = arith.divf %16, %15 : vector<16x10xf32>
    %cst_6 = arith.constant 0.000000e+00 : f32
    %18 = vector.broadcast %cst_6 : f32 to vector<16x10xf32>
    %19 = arith.cmpf oge, %3, %18 : vector<16x10xf32>
    %20 = arith.mulf %13, %17 : vector<16x10xf32>
    %21 = arith.select %19, %17, %20 : vector<16x10xi1>, vector<16x10xf32>
    %22 = arith.mulf %21, %9 : vector<16x10xf32>
    %cst_7 = arith.constant 1.000000e+00 : f32
    %23 = vector.broadcast %cst_7 : f32 to vector<16x10xf32>
    %24 = arith.subf %23, %21 : vector<16x10xf32>
    %cst_8 = arith.constant 1.000000e+00 : f32
    %25 = vector.broadcast %cst_8 : f32 to vector<16x10xf32>
    %26 = arith.subf %25, %9 : vector<16x10xf32>
    %27 = arith.mulf %24, %26 : vector<16x10xf32>
    %28 = arith.addf %22, %27 : vector<16x10xf32>
    %cst_9 = arith.constant 1.000000e+00 : f32
    %29 = vector.broadcast %cst_9 : f32 to vector<16x10xf32>
    %30 = arith.subf %29, %28 : vector<16x10xf32>
    %cst_10 = arith.constant 2.500000e-01 : f32
    %31 = vector.broadcast %cst_10 : f32 to vector<16x10xf32>
    %32 = arith.mulf %31, %9 : vector<16x10xf32>
    %cst_11 = arith.constant 1.000000e+00 : f32
    %33 = vector.broadcast %cst_11 : f32 to vector<16x10xf32>
    %34 = arith.subf %33, %9 : vector<16x10xf32>
    %cst_12 = arith.constant 7.500000e-01 : f32
    %35 = vector.broadcast %cst_12 : f32 to vector<16x10xf32>
    %36 = arith.mulf %35, %34 : vector<16x10xf32>
    %37 = arith.addf %32, %36 : vector<16x10xf32>
    %38 = arith.mulf %30, %30 : vector<16x10xf32>
    %39 = arith.mulf %37, %38 : vector<16x10xf32>
    %cst_13 = arith.constant 0.000000e+00 : f32
    %40 = vector.broadcast %cst_13 : f32 to vector<16x10xf32>
    %41 = arith.maximumf %3, %40 : vector<16x10xf32>
    %42 = arith.mulf %3, %9 : vector<16x10xf32>
    %43 = arith.subf %41, %42 : vector<16x10xf32>
    %44 = math.log1p %13 : vector<16x10xf32>
    %45 = arith.addf %43, %44 : vector<16x10xf32>
    %46 = arith.mulf %39, %45 : vector<16x10xf32>
    %c0_14 = arith.constant 0 : index
    %c0_15 = arith.constant 0 : index
    %47 = vector.load %arg5[%c0_14, %c0_15] : memref<1x10xf32, #tpu.memory_space<vmem>>, vector<1x10xf32>
    %cst_16 = arith.constant dense<0.000000e+00> : vector<10xf32>
    %48 = vector.multi_reduction <add>, %46, %cst_16 [0] : vector<16x10xf32> to vector<10xf32>
    %49 = vector.shape_cast %48 : vector<10xf32> to vector<1x10xf32>
    %50 = arith.addf %47, %49 : vector<1x10xf32>
    %c0_17 = arith.constant 0 : index
    %c0_18 = arith.constant 0 : index
    %51 = vector.load %arg5[%c0_17, %c0_18] : memref<1x10xf32, #tpu.memory_space<vmem>>, vector<1x10xf32>
    tpu.vector_store %arg5[%c0_17, %c0_18], %50 {strides = array<i32>} : memref<1x10xf32, #tpu.memory_space<vmem>>, vector<1x10xf32>,
    %c0_i32_19 = arith.constant 0 : i32
    %52 = arith.cmpi eq, %arg1, %c0_i32_19 : i32
    %53 = arith.extui %52 : i1 to i32
    %c0_i32_20 = arith.constant 0 : i32
    %54 = arith.cmpi ne, %53, %c0_i32_20 : i32
    scf.if %54 {
      %c0_21 = arith.constant 0 : index
      %c0_22 = arith.constant 0 : index
      %55 = vector.load %arg5[%c0_21, %c0_22] : memref<1x10xf32, #tpu.memory_space<vmem>>, vector<1x10xf32>
      %56 = vector.shape_cast %55 : vector<1x10xf32> to vector<1x1x10xf32>
      %cst_23 = arith.constant dense<0.000000e+00> : vector<1xf32>
      %57 = vector.multi_reduction <add>, %56, %cst_23 [1, 2] : vector<1x1x10xf32> to vector<1xf32>
      %58 = vector.shape_cast %57 : vector<1xf32> to vector<1x1x1xf32>
      %59 = vector.extract %58[0, 0, 0] : f32 from vector<1x1x1xf32>
      %60 = vector.broadcast %59 : f32 to vector<1x1xf32>
      %c0_24 = arith.constant 0 : index
      %c0_25 = arith.constant 0 : index
      %c0_26 = arith.constant 0 : index
      %61 = vector.load %arg4[%c0_24, %c0_25, %c0_26] : memref<1x1x1xf32, #tpu.memory_space<vmem>>, vector<1x1x1xf32>
      %62 = vector.shape_cast %61 : vector<1x1x1xf32> to vector<1x1xf32>
      %63 = vector.shape_cast %60 : vector<1x1xf32> to vector<1x1x1xf32>
      tpu.vector_store %arg4[%c0_24, %c0_25, %c0_26], %63 {strides = array<i32>} : memref<1x1x1xf32, #tpu.memory_space<vmem>>, vector<1x1x1xf32>,
    } else {
    }
    return
  }
  func.func @transform_0(%arg0: i32, %arg1: i32) -> (i32, i32) {
    %c1_i32 = arith.constant 1 : i32
    %0 = arith.muli %arg0, %c1_i32 : i32
    %1 = arith.addi %0, %arg1 : i32
    %c0_i32 = arith.constant 0 : i32
    %c0_i32_0 = arith.constant 0 : i32
    return %1, %c0_i32 : i32, i32
  }
  func.func @transform_1(%arg0: i32, %arg1: i32) -> (i32, i32) {
    %c1_i32 = arith.constant 1 : i32
    %0 = arith.muli %arg0, %c1_i32 : i32
    %1 = arith.addi %0, %arg1 : i32
    %c0_i32 = arith.constant 0 : i32
    %c0_i32_0 = arith.constant 0 : i32
    return %1, %c0_i32 : i32, i32
  }
  func.func @transform_2(%arg0: i32, %arg1: i32) -> (i32, i32, i32) {
    %c0_i32 = arith.constant 0 : i32
    %c0_i32_0 = arith.constant 0 : i32
    %c0_i32_1 = arith.constant 0 : i32
    return %arg0, %c0_i32, %c0_i32_0 : i32, i32, i32
  }
}

</mosaic_0001>

<bundles_post_ra>
// kernel: tpu_custom_call.1
= control target key start
LH: loop header
LB: loop body
LE: loop exit
PB: predicated region body
PF: predicated region fallthrough
CT: control target
= control target key end

     0   :  { %v251_v1 = vmov 0   ;;  %s320_s0 = inlined_call_operand.vmem [shape: f32[16,10], index: 0, kind: input, shape index: {}]   ;;  %s321_s1 = inlined_call_operand.vmem [shape: s32[16,1], index: 1, kind: input, shape index: {}]   ;;  %s322_s2 = inlined_call_operand.hbm [shape: f32[1,1,1], index: 2, kind: output, shape index: {}]  }
   0x1   :  { %v64_v0 = vld [vmem:[%s321_s1] sm:$0xff]  ;;  %214 = vset.pattern.permute.xlu0 %v251_v1 }
   0x2   :  { %7 = vsyncpa [#allocation4], 0  ;;  %69 = vperm.xlu0 %214, %v64_v0   ;;  %v65_v2 = vld [vmem:[%s321_s1 + $0x8] sm:$0xff]  ;;  %vm60_vm0 = vcmask 73728   ;;  %v252_v3 = vmov 0.0   ;;  %v279_v4 = vld [vmem:[%s320_s0] sm:$0xff]  ;;  %v66_v17 = vlaneseq }
   0x3   :  { %61 = vst.msk [vmem:[#allocation2] sm:$0x1] %vm60_vm0, %v252_v3  ;;  %v80_v5 = vand.u32 2147483647, %v279_v4  ;;  %v285_v6 = vld [vmem:[%s320_s0 + $0x8] sm:$0xff]  ;;  %vm94_vm1 = vcmp.ge.f32.partialorder %v279_v4, 0.0 }
   0x4   :  { %v81_v8 = vand.u32 2147483647, %v285_v6  ;;  %v67_v20 = vand.u32 127, %v66_v17  ;;  %vm95_vm2 = vcmp.ge.f32.partialorder %v285_v6, 0.0  ;;  %v122_v39 = vmax.f32 %v279_v4, 0.0  ;;  %s253_s0 = smov [#allocation3]  }
   0x5   :  { %v82_v7 = vsub.f32 0.0, %v80_v5  ;;  %v123_v46 = vmax.f32 %v285_v6, 0.0  ;;  %vm151_vm7 = vcmask 80896   ;;  %s187_s1 = sshll.u32 %s253_s0, 4  ;;  %vm179_vm8 = vcmask 0   ;;  %s188_s1 = int_to_ptr.vmem [resolvable:$true] %s187_s1 }
   0x6   :  { %72 = vperm.xlu0 %214, %v65_v2   ;;  %v83_v10 = vsub.f32 0.0, %v81_v8  ;;  %s227_s18 = scalar_lea.vmem %s188_s1, 16  ;;  %s231_s19 = scalar_lea.vmem %s188_s1, 32 }
   0x7   :  { %v84_v9 = vmul.f32 1.442695, %v82_v7  ;;  %p228_p0 = scmp.ne.s32.totalorder %s188_s1, %s227_s18  ;;  %p232_p1 = scmp.lt.s32.totalorder %s188_s1, %s188_s1 }
   0x8   :  { %v86_v11 = vmul.f32 1.442695, %v83_v10  ;;  %p233_p2 = scmp.lt.s32.totalorder %s231_s19, %s227_s18 }
   0x9   :  { %215 = vpow2.f32 %v84_v9 }
   0xa   :  { %217 = vpow2.f32 %v86_v11  ;;  %p234_p3 = por %p233_p2, %p232_p1 }
   0xc   :  { %p235_p4 = pnand %p234_p3, %p228_p0 }
  0x13   :  { %v216_v12 = vpop.eup %215 }
  0x14   :  { %v88_v13 = vadd.f32 1.0, %v216_v12  ;;  %v218_v14 = vpop.eup %217  ;;  %v131_v25 = vmul.f32 -0.5, %v216_v12  ;;  %v134_v30 = vand.u32 2147483647, %v216_v12 }
  0x15   :  { %v89_v15 = vadd.f32 1.0, %v218_v14  ;;  %v140_v29 = vmul.f32 -0.5, %v218_v14  ;;  %v143_v41 = vand.u32 2147483647, %v218_v14 }
  0x16   :  { %219 = vrcp.f32 %v88_v13  ;;  %v132_v34 = vadd.f32 1.0, %v131_v25  ;;  %vm293_vm5 = vcmp.lt.f32.partialorder %v134_v30, 0.0004427343 }
  0x17   :  { %221 = vrcp.f32 %v89_v15  ;;  %v141_v40 = vadd.f32 1.0, %v140_v29  ;;  %vm298_vm6 = vcmp.lt.f32.partialorder %v143_v41, 0.0004427343 }
  0x18   :  { %223 = vlog2.f32 %v88_v13  ;;  %v133_v49 = vmul.f32 %v216_v12, %v132_v34 }
  0x19   :  { %225 = vlog2.f32 %v89_v15  ;;  %v142_v57 = vmul.f32 %v218_v14, %v141_v40 }
  0x20   :  { %v220_v16 = vpop.eup %219 }
  0x21   :  { %v96_v18 = vmul.f32 %v220_v16, %v216_v12  ;;  %v222_v19 = vpop.eup %221 }
  0x22   :  { %v97_v22 = vmul.f32 %v222_v19, %v218_v14  ;;  %v224_v35 = vpop.eup %223 }
  0x23   :  { %v98_v21 = vsel %vm94_vm1, %v220_v16, %v96_v18  ;;  %v226_v42 = vpop.eup %225  ;;  %v130_v48 = vmul.f32 0.6931472, %v224_v35 }
  0x24   :  { %v102_v24 = vsub.f32 1.0, %v98_v21  ;;  %v99_v28 = vsel %vm95_vm2, %v222_v19, %v97_v22  ;;  %v139_v56 = vmul.f32 0.6931472, %v226_v42 }
  0x25   :  { %v103_v37 = vsub.f32 1.0, %v99_v28  ;;  %v136_v63 = vsel %vm293_vm5, %v133_v49, %v130_v48 }
  0x81   :  { %v70_v23 = vpop.permute.xlu0 %69 }
  0x82   :  { %vm74_vm3 = vcmp.eq.s32.totalorder %v67_v20, %v70_v23 }
  0x83   :  { %v207_v26 = vsel %vm74_vm3, 1.0, %v252_v3 }
  0x84   :  { %v104_v27 = vsub.f32 1.0, %v207_v26  ;;  %v100_v32 = vmul.f32 %v207_v26, %v98_v21  ;;  %v124_v44 = vmul.f32 %v207_v26, %v279_v4  ;;  %v112_v51 = vmul.f32 0.25, %v207_v26 }
  0x85   :  { %v73_v31 = vpop.permute.xlu0 %72  ;;  %v145_v4 = vsel %vm298_vm6, %v142_v57, %v139_v56 }
  0x86   :  { %v106_v33 = vmul.f32 %v104_v27, %v102_v24  ;;  %vm75_vm4 = vcmp.eq.s32.totalorder %v67_v20, %v73_v31  ;;  %v114_v43 = vmul.f32 0.75, %v104_v27  ;;  %v126_v60 = vsub.f32 %v122_v39, %v124_v44  ;;  %v150_v20 = vld [vmem:[#allocation2] sm:$0x1] }
  0x87   :  { %v208_v36 = vsel %vm75_vm4, 1.0, %v252_v3 }
  0x88   :  { %v108_v38 = vadd.f32 %v106_v33, %v100_v32  ;;  %v105_v45 = vsub.f32 1.0, %v208_v36  ;;  %v101_v52 = vmul.f32 %v208_v36, %v99_v28  ;;  %v125_v54 = vmul.f32 %v208_v36, %v285_v6 }
  0x89   :  { %v116_v59 = vadd.f32 %v114_v43, %v112_v51  ;;  %v113_v2 = vmul.f32 0.25, %v208_v36  ;;  %v146_v5 = vadd.f32 %v136_v63, %v126_v60 }
  0x8a   :  { %v110_v47 = vsub.f32 1.0, %v108_v38  ;;  %v107_v53 = vmul.f32 %v105_v45, %v103_v37  ;;  %v115_v62 = vmul.f32 0.75, %v105_v45  ;;  %v127_v3 = vsub.f32 %v123_v46, %v125_v54 }
  0x8c   :  { %v118_v55 = vmul.f32 %v110_v47, %v110_v47  ;;  %v109_v61 = vadd.f32 %v107_v53, %v101_v52  ;;  %v117_v6 = vadd.f32 %v115_v62, %v113_v2  ;;  %v147_v10 = vadd.f32 %v145_v4, %v127_v3 }
  0x8e   :  { %v120_v0 = vmul.f32 %v118_v55, %v116_v59  ;;  %v111_v1 = vsub.f32 1.0, %v109_v61 }
  0x90   :  { %v119_v7 = vmul.f32 %v111_v1, %v111_v1  ;;  %v148_v8 = vmul.f32 %v146_v5, %v120_v0 }
  0x92   :  { %v121_v9 = vmul.f32 %v119_v7, %v117_v6  ;;  %v152_v12 = vsel %vm151_vm7, %v148_v8, 0.0 }
  0x94   :  { %v149_v11 = vmul.f32 %v147_v10, %v121_v9 }
  0x96   :  { %v153_v13 = vsel %vm151_vm7, %v149_v11, 0.0 }
  0x97   :  { %v154_v14 = vadd.f32 %v153_v13, %v152_v12 }
  0x99   :  { %v155_v15 = vrot.slane %v154_v14, 4 }
  0x9b   :  { %v156_v16 = vadd.f32 %v155_v15, %v154_v14 }
  0x9d   :  { %v157_v17 = vrot.slane %v156_v16, 2 }
  0x9f   :  { %v158_v18 = vadd.f32 %v157_v17, %v156_v16 }
  0xa1   :  { %v159_v19 = vrot.slane %v158_v18, 1 }
  0xa3   :  { %v160_v21 = vadd.f32 %v159_v19, %v158_v18 }
  0xa5   :  { %v161_v22 = vadd.f32 %v160_v21, %v150_v20 }
  0xa7   :  { %163 = vst.msk [vmem:[#allocation2] sm:$0x1] %vm60_vm0, %v161_v22 }
  0xae   :  { %v167_v23 = vld [vmem:[#allocation2] sm:$0x1] }
  0xaf   :  { %v168_v24 = vsel %vm60_vm0, %v167_v23, 0.0 }
  0xb0   :  { %169 = vadd.xlane.f32.xlu1 %v168_v24 }
 0x13d   :  { %v170_v25 = vpop.xlane.xlu1 %169 }
 0x13e   :  { %v171_v26 = vrot.slane %v170_v25, 4 }
 0x140   :  { %v172_v27 = vadd.f32 %v171_v26, %v170_v25 }
 0x142   :  { %v173_v28 = vrot.slane %v172_v27, 2 }
 0x144   :  { %v174_v29 = vadd.f32 %v173_v28, %v172_v27 }
 0x146   :  { %v175_v30 = vrot.slane %v174_v29, 1 }
 0x148   :  { %v176_v31 = vadd.f32 %v175_v30, %v174_v29 }
 0x14a   :  { %209 = vpush %v176_v31 }
 0x17b   :  { %s210_s17 = spop %209 }
 0x17c   :  { %v178_v32 = vstv %s210_s17 }
 0x17d   :  { %180 = vst.msk [vmem:[#allocation3] sm:$0x1] %vm179_vm8, %v178_v32 }
 0x17e   :  { %238 = shalt.err (!%p235_p4)
}
 0x17f   :  { %s239_s22 = scalar_lea.hbm %s322_s2, 16 }
 0x180   :  { %p240_p5 = scmp.ne.s32.totalorder %s322_s2, %s239_s22  ;;  %p243_p6 = scmp.lt.u32.totalorder %s239_s22, %s322_s2 }
 0x182   :  { %p245_p7 = pnand %p243_p6, %p240_p5 }
 0x184   :  { %248 = shalt.err (!%p245_p7)
}
 0x185   :  { %190 = dma.vmem_to_hbm [thread:$0]  %s188_s1, 16, %s322_s2, [#allocation4]  }
 0x186   :  { %249 = dma.done.wait [#allocation4], 16  }
 0x187   :  { %250 = vsyncadd [#allocation4], 4294967280 }
 0x188   :  { %194 = vsyncpa [#allocation4], 1 }

</bundles_post_ra>
